<compile_context>
chip_gen: v7x
topology: tpu7x:2x2x1
jax: 0.10.0
libtpu: 0.0.40
codegen_flags: <defaults>
</compile_context>

<pallas_src>
import jax
import jax.numpy as jnp
from jax.experimental import pallas as pl
from jax.experimental.pallas import tpu as pltpu

NEG_BIG = -1e30  # finite "effectively -inf" bias for padded logit columns


def policy_kernel(x_ref, w1_ref, b1_ref, w2_ref, b2_ref, w3_ref, b3_ref, out_ref):
    # MXU matmuls on bf16 inputs with f32 accumulation; biases added in f32.
    x = x_ref[...].astype(jnp.bfloat16)

    # Layer 1: Linear(8 -> 256) + ReLU  (single MXU pass, K=8).
    h1 = jnp.dot(x, w1_ref[...], preferred_element_type=jnp.float32) + b1_ref[...]
    h1 = jnp.maximum(h1, 0.0).astype(jnp.bfloat16)

    # Layer 2: Linear(256 -> 256) + ReLU.
    h2 = jnp.dot(h1, w2_ref[...], preferred_element_type=jnp.float32) + b2_ref[...]
    h2 = jnp.maximum(h2, 0.0).astype(jnp.bfloat16)

    # Layer 3: Linear(256 -> 128-padded logits).  Pad columns have zero weights
    # (exact in bf16) and NEG_BIG f32 bias, so after the stable softmax they come
    # out exactly 0.
    logits = jnp.dot(h2, w3_ref[...], preferred_element_type=jnp.float32) + b3_ref[...]

    # Numerically stable softmax over the (lane-dense) last dim.  Exact divide so
    # every row sums to 1 (the approximate EUP reciprocal was the correctness bug).
    m = jnp.max(logits, axis=-1, keepdims=True)
    e = jnp.exp(logits - m)                      # exp(NEG_BIG - m) underflows to 0
    s = jnp.sum(e, axis=-1, keepdims=True)
    out_ref[...] = e / s


def _choose_tile_b(batch):
    """Sublane-aligned batch tile.  Small batches -> one tile (latency path);
    large batches -> 512-row tiles (amortizes per-grid-step overhead, guarantees
    >= 2 grid steps so the parallel axis can use both v7x TensorCores, and stays
    well inside v5e's 16 MiB scoped VMEM)."""
    b8 = max(8, ((batch + 7) // 8) * 8)
    return b8 if b8 <= 512 else 512


def policy_forward(x, params, *, tile_b=None, lane_pad=128):
    """x: (B, input_dim) f32.  params: (w1,b1,w2,b2,w3,b3) with weights stored as
    (in_features, out_features) f32 and biases as (1, out_features) f32."""
    w1, b1, w2, b2, w3, b3 = params
    B, in_dim = x.shape
    out_dim = w3.shape[1]
    out_pad = max(lane_pad, out_dim)

    # bf16 weights for the MXU (f32 accumulation in-kernel); biases stay f32.
    w1b = w1.astype(jnp.bfloat16)
    w2b = w2.astype(jnp.bfloat16)
    # Lane-pad the last layer: zero weight columns, very-negative f32 bias columns.
    w3p = jnp.pad(w3, ((0, 0), (0, out_pad - out_dim))).astype(jnp.bfloat16)
    b3p = jnp.pad(b3, ((0, 0), (0, out_pad - out_dim)), constant_values=NEG_BIG)

    # Sublane/tile-pad the batch.
    if tile_b is None:
        tile_b = _choose_tile_b(B)
    b_pad = pl.cdiv(B, tile_b) * tile_b
    xp = jnp.pad(x, ((0, b_pad - B), (0, 0))) if b_pad != B else x

    resident = lambda i: (0, 0)  # weights/biases: same full block every grid step

    out = pl.pallas_call(
        policy_kernel,
        out_shape=jax.ShapeDtypeStruct((b_pad, out_pad), jnp.float32),
        grid_spec=pltpu.PrefetchScalarGridSpec(
            num_scalar_prefetch=0,
            grid=(b_pad // tile_b,),
            in_specs=[
                pl.BlockSpec((tile_b, in_dim), lambda i: (i, 0)),  # x tile
                pl.BlockSpec(w1b.shape, resident),
                pl.BlockSpec(b1.shape, resident),
                pl.BlockSpec(w2b.shape, resident),
                pl.BlockSpec(b2.shape, resident),
                pl.BlockSpec(w3p.shape, resident),
                pl.BlockSpec(b3p.shape, resident),
            ],
            out_specs=pl.BlockSpec((tile_b, out_pad), lambda i: (i, 0)),
        ),
        compiler_params=pltpu.CompilerParams(
            dimension_semantics=("parallel",),  # batch tiles independent (v7x 2 TCs)
        ),
    )(xp, w1b, b1, w2b, b2, w3p, b3p)

    # TODO(synk): in a real RL inference loop, consume the padded (b_pad, 128)
    # block directly (or fuse argmax/sampling into the kernel) instead of paying
    # for this pad + slice pass every step.
    return out[:B, :out_dim]


def init_params(key, input_dim=8, hidden=256, output_dim=4):
    """Deterministic init mirroring PyTorch's default Linear init
    (uniform in [-1/sqrt(fan_in), 1/sqrt(fan_in)])."""
    def linear(key, fan_in, fan_out):
        kw, kb = jax.random.split(key)
        bound = 1.0 / jnp.sqrt(fan_in)
        # stored as (in, out) so the kernel does x @ W  (== x @ W_torch.T)
        w = jax.random.uniform(kw, (fan_in, fan_out), jnp.float32, -bound, bound)
        b = jax.random.uniform(kb, (1, fan_out), jnp.float32, -bound, bound)
        return w, b

    k1, k2, k3 = jax.random.split(key, 3)
    w1, b1 = linear(k1, input_dim, hidden)
    w2, b2 = linear(k2, hidden, hidden)
    w3, b3 = linear(k3, hidden, output_dim)
    return (w1, b1, w2, b2, w3, b3)


def reference_forward(x, params, *, bf16_matmuls=False):
    """Plain-JAX reference.  bf16_matmuls=True mirrors the kernel's bf16-input /
    f32-accumulate matmuls exactly (for tight-tolerance checks)."""
    w1, b1, w2, b2, w3, b3 = params

    def dot(a, w):
        if bf16_matmuls:
            return jnp.dot(a.astype(jnp.bfloat16), w.astype(jnp.bfloat16),
                           preferred_element_type=jnp.float32)
        return jnp.dot(a, w, preferred_element_type=jnp.float32)

    h1 = jnp.maximum(dot(x, w1) + b1, 0.0)
    h2 = jnp.maximum(dot(h1, w2) + b2, 0.0)
    logits = dot(h2, w3) + b3
    return jax.nn.softmax(logits, axis=-1)


if __name__ == "__main__":
    key = jax.random.PRNGKey(0)
    kx, kp, kx2 = jax.random.split(key, 3)

    B, INPUT_DIM, OUTPUT_DIM = 2, 8, 4
    params = init_params(kp, input_dim=INPUT_DIM, hidden=256, output_dim=OUTPUT_DIM)

    # --- Small-batch case (single-env RL step; single sublane-aligned tile). ---
    x = jax.random.normal(kx, (B, INPUT_DIM), dtype=jnp.float32)
    out = jax.block_until_ready(policy_forward(x, params))
    assert out.shape == (B, OUTPUT_DIM)
    # Exact normalization: every row sums to 1 within f32 rounding.
    assert jnp.allclose(jnp.sum(out, axis=-1), 1.0, atol=1e-5)
    # Tight check vs a reference using the same bf16-matmul / f32-accumulate math.
    assert jnp.allclose(out, reference_forward(x, params, bf16_matmuls=True),
                        atol=2e-3, rtol=2e-3)
    # Looser sanity check vs the pure-f32 reference (bf16 matmul rounding only).
    assert jnp.allclose(out, reference_forward(x, params), atol=2e-2, rtol=2e-2)

    # --- Batched case: default 512-row tiles + batch padding (1200 -> 1536, grid=3). ---
    B2 = 1200
    x2 = jax.random.normal(kx2, (B2, INPUT_DIM), dtype=jnp.float32)
    out2 = jax.block_until_ready(policy_forward(x2, params))
    assert out2.shape == (B2, OUTPUT_DIM)
    assert jnp.allclose(jnp.sum(out2, axis=-1), 1.0, atol=1e-5)
    assert jnp.allclose(out2, reference_forward(x2, params, bf16_matmuls=True),
                        atol=2e-3, rtol=2e-3)
    assert jnp.allclose(out2, reference_forward(x2, params), atol=2e-2, rtol=2e-2)

    # --- Explicit small tile: exercises the many-grid-step path (grid=10). ---
    out2_tiled = jax.block_until_ready(policy_forward(x2, params, tile_b=128))
    assert jnp.allclose(out2_tiled, out2, atol=1e-6, rtol=1e-6)

    print("KERNEL_OK")
</pallas_src>

<mosaic_0001>
module attributes {stable_mosaic.version = 11 : i64} {
  func.func @policy_kernel(%arg0: i32, %arg1: memref<8x8xf32, #tpu.memory_space<vmem>>, %arg2: memref<8x256xbf16, #tpu.memory_space<vmem>>, %arg3: memref<1x256xf32, #tpu.memory_space<vmem>>, %arg4: memref<256x256xbf16, #tpu.memory_space<vmem>>, %arg5: memref<1x256xf32, #tpu.memory_space<vmem>>, %arg6: memref<256x128xbf16, #tpu.memory_space<vmem>>, %arg7: memref<1x128xf32, #tpu.memory_space<vmem>>, %arg8: memref<8x128xf32, #tpu.memory_space<vmem>>) attributes {dimension_semantics = [#tpu.dimension_semantics<parallel>], iteration_bounds = array<i64: 1>, scalar_prefetch = 0 : i64, scratch_operands = 0 : i64, tpu.core_type = #tpu.core_type<tc>, window_params = [{transform_indices = @transform_0, window_bounds = array<i64: 8, 8>}, {pipeline_mode = #tpu.pipeline_mode<synchronous>, transform_indices = @transform_1, window_bounds = array<i64: 8, 256>}, {pipeline_mode = #tpu.pipeline_mode<synchronous>, transform_indices = @transform_2, window_bounds = array<i64: 1, 256>}, {pipeline_mode = #tpu.pipeline_mode<synchronous>, transform_indices = @transform_3, window_bounds = array<i64: 256, 256>}, {pipeline_mode = #tpu.pipeline_mode<synchronous>, transform_indices = @transform_4, window_bounds = array<i64: 1, 256>}, {pipeline_mode = #tpu.pipeline_mode<synchronous>, transform_indices = @transform_5, window_bounds = array<i64: 256, 128>}, {pipeline_mode = #tpu.pipeline_mode<synchronous>, transform_indices = @transform_6, window_bounds = array<i64: 1, 128>}, {transform_indices = @transform_7, window_bounds = array<i64: 8, 128>}]} {
    %c0 = arith.constant 0 : index
    %c0_0 = arith.constant 0 : index
    %0 = vector.load %arg1[%c0, %c0_0] : memref<8x8xf32, #tpu.memory_space<vmem>>, vector<8x8xf32>
    %1 = arith.truncf %0 : vector<8x8xf32> to vector<8x8xbf16>
    %c0_1 = arith.constant 0 : index
    %c0_2 = arith.constant 0 : index
    %2 = vector.load %arg2[%c0_1, %c0_2] : memref<8x256xbf16, #tpu.memory_space<vmem>>, vector<8x256xbf16>
    %cst = arith.constant dense<0.000000e+00> : vector<8x256xf32>
    %3 = tpu.matmul %1, %2, %cst {dimension_numbers = #tpu.dot_dimension_numbers<[1], [0], [0], [1], [0, 0, 1, 1], [], []>} : vector<8x8xbf16>, vector<8x256xbf16>, vector<8x256xf32> -> vector<8x256xf32>
    %c0_3 = arith.constant 0 : index
    %c0_4 = arith.constant 0 : index
    %4 = vector.load %arg3[%c0_3, %c0_4] : memref<1x256xf32, #tpu.memory_space<vmem>>, vector<1x256xf32>
    %5 = vector.broadcast %4 : vector<1x256xf32> to vector<8x256xf32>
    %6 = arith.addf %3, %5 : vector<8x256xf32>
    %cst_5 = arith.constant 0.000000e+00 : f32
    %7 = vector.broadcast %cst_5 : f32 to vector<8x256xf32>
    %8 = arith.maximumf %6, %7 : vector<8x256xf32>
    %9 = arith.truncf %8 : vector<8x256xf32> to vector<8x256xbf16>
    %c0_6 = arith.constant 0 : index
    %c0_7 = arith.constant 0 : index
    %10 = vector.load %arg4[%c0_6, %c0_7] : memref<256x256xbf16, #tpu.memory_space<vmem>>, vector<256x256xbf16>
    %cst_8 = arith.constant dense<0.000000e+00> : vector<8x256xf32>
    %11 = tpu.matmul %9, %10, %cst_8 {dimension_numbers = #tpu.dot_dimension_numbers<[1], [0], [0], [1], [0, 0, 1, 1], [], []>} : vector<8x256xbf16>, vector<256x256xbf16>, vector<8x256xf32> -> vector<8x256xf32>
    %c0_9 = arith.constant 0 : index
    %c0_10 = arith.constant 0 : index
    %12 = vector.load %arg5[%c0_9, %c0_10] : memref<1x256xf32, #tpu.memory_space<vmem>>, vector<1x256xf32>
    %13 = vector.broadcast %12 : vector<1x256xf32> to vector<8x256xf32>
    %14 = arith.addf %11, %13 : vector<8x256xf32>
    %cst_11 = arith.constant 0.000000e+00 : f32
    %15 = vector.broadcast %cst_11 : f32 to vector<8x256xf32>
    %16 = arith.maximumf %14, %15 : vector<8x256xf32>
    %17 = arith.truncf %16 : vector<8x256xf32> to vector<8x256xbf16>
    %c0_12 = arith.constant 0 : index
    %c0_13 = arith.constant 0 : index
    %18 = vector.load %arg6[%c0_12, %c0_13] : memref<256x128xbf16, #tpu.memory_space<vmem>>, vector<256x128xbf16>
    %cst_14 = arith.constant dense<0.000000e+00> : vector<8x128xf32>
    %19 = tpu.matmul %17, %18, %cst_14 {dimension_numbers = #tpu.dot_dimension_numbers<[1], [0], [0], [1], [0, 0, 1, 1], [], []>} : vector<8x256xbf16>, vector<256x128xbf16>, vector<8x128xf32> -> vector<8x128xf32>
    %c0_15 = arith.constant 0 : index
    %c0_16 = arith.constant 0 : index
    %20 = vector.load %arg7[%c0_15, %c0_16] : memref<1x128xf32, #tpu.memory_space<vmem>>, vector<1x128xf32>
    %21 = vector.broadcast %20 : vector<1x128xf32> to vector<8x128xf32>
    %22 = arith.addf %19, %21 : vector<8x128xf32>
    %cst_17 = arith.constant dense<0xFF800000> : vector<8xf32>
    %23 = vector.multi_reduction <maximumf>, %22, %cst_17 [1] : vector<8x128xf32> to vector<8xf32>
    %24 = vector.shape_cast %23 : vector<8xf32> to vector<8x1xf32>
    %25 = vector.broadcast %24 : vector<8x1xf32> to vector<8x128xf32>
    %26 = arith.subf %22, %25 : vector<8x128xf32>
    %27 = math.exp %26 : vector<8x128xf32>
    %cst_18 = arith.constant dense<0.000000e+00> : vector<8xf32>
    %28 = vector.multi_reduction <add>, %27, %cst_18 [1] : vector<8x128xf32> to vector<8xf32>
    %29 = vector.shape_cast %28 : vector<8xf32> to vector<8x1xf32>
    %30 = vector.broadcast %29 : vector<8x1xf32> to vector<8x128xf32>
    %31 = arith.divf %27, %30 : vector<8x128xf32>
    %c0_19 = arith.constant 0 : index
    %c0_20 = arith.constant 0 : index
    %32 = vector.load %arg8[%c0_19, %c0_20] : memref<8x128xf32, #tpu.memory_space<vmem>>, vector<8x128xf32>
    tpu.vector_store %arg8[%c0_19, %c0_20], %31 {strides = array<i32>} : memref<8x128xf32, #tpu.memory_space<vmem>>, vector<8x128xf32>,
    return
  }
  func.func @transform_0(%arg0: i32) -> (i32, i32) {
    %c0_i32 = arith.constant 0 : i32
    %c0_i32_0 = arith.constant 0 : i32
    return %arg0, %c0_i32 : i32, i32
  }
  func.func @transform_1(%arg0: i32) -> (i32, i32) {
    %c0_i32 = arith.constant 0 : i32
    %c0_i32_0 = arith.constant 0 : i32
    %c0_i32_1 = arith.constant 0 : i32
    return %c0_i32, %c0_i32_0 : i32, i32
  }
  func.func @transform_2(%arg0: i32) -> (i32, i32) {
    %c0_i32 = arith.constant 0 : i32
    %c0_i32_0 = arith.constant 0 : i32
    %c0_i32_1 = arith.constant 0 : i32
    return %c0_i32, %c0_i32_0 : i32, i32
  }
  func.func @transform_3(%arg0: i32) -> (i32, i32) {
    %c0_i32 = arith.constant 0 : i32
    %c0_i32_0 = arith.constant 0 : i32
    %c0_i32_1 = arith.constant 0 : i32
    return %c0_i32, %c0_i32_0 : i32, i32
  }
  func.func @transform_4(%arg0: i32) -> (i32, i32) {
    %c0_i32 = arith.constant 0 : i32
    %c0_i32_0 = arith.constant 0 : i32
    %c0_i32_1 = arith.constant 0 : i32
    return %c0_i32, %c0_i32_0 : i32, i32
  }
  func.func @transform_5(%arg0: i32) -> (i32, i32) {
    %c0_i32 = arith.constant 0 : i32
    %c0_i32_0 = arith.constant 0 : i32
    %c0_i32_1 = arith.constant 0 : i32
    return %c0_i32, %c0_i32_0 : i32, i32
  }
  func.func @transform_6(%arg0: i32) -> (i32, i32) {
    %c0_i32 = arith.constant 0 : i32
    %c0_i32_0 = arith.constant 0 : i32
    %c0_i32_1 = arith.constant 0 : i32
    return %c0_i32, %c0_i32_0 : i32, i32
  }
  func.func @transform_7(%arg0: i32) -> (i32, i32) {
    %c0_i32 = arith.constant 0 : i32
    %c0_i32_0 = arith.constant 0 : i32
    return %arg0, %c0_i32 : i32, i32
  }
}

</mosaic_0001>

<bundles_post_ra>
// kernel: tpu_custom_call.1
= control target key start
LH: loop header
LB: loop body
LE: loop exit
PB: predicated region body
PF: predicated region fallthrough
CT: control target
= control target key end

     0   :  { %12 = vsyncpa [#allocation3], 0  ;;  %s998_s0 = inlined_call_operand.hbm [shape: f32[8,8], index: 0, kind: input, shape index: {}]   ;;  %s999_s1 = inlined_call_operand.hbm [shape: bf16[8,256], index: 1, kind: input, shape index: {}]   ;;  %s1000_s2 = inlined_call_operand.vmem [shape: f32[1,256], index: 2, kind: input, shape index: {}]   ;;  %s1001_s3 = inlined_call_operand.hbm [shape: bf16[256,256], index: 3, kind: input, shape index: {}]   ;;  %s1002_s4 = inlined_call_operand.vmem [shape: f32[1,256], index: 4, kind: input, shape index: {}]   ;;  %s1003_s5 = inlined_call_operand.hbm [shape: bf16[256,128], index: 5, kind: input, shape index: {}]   ;;  %s1004_s6 = inlined_call_operand.vmem [shape: f32[1,128], index: 6, kind: input, shape index: {}]   ;;  %s1005_s7 = inlined_call_operand.hbm [shape: f32[8,128], index: 7, kind: output, shape index: {}]  }
   0x1   :  { %13 = vsyncpa [#allocation6], 0 }
   0x2   :  { %14 = vsyncpa [#allocation9], 0 }
   0x3   :  { %15 = vsyncpa [#allocation4], 0  ;;  %s879_s24 = smov [#allocation5]   ;;  %s880_s26 = smov [#allocation2]  }
   0x4   :  { %s32_s25 = sshll.u32 %s879_s24, 4  ;;  %s22_s27 = sshll.u32 %s880_s26, 4  ;;  %s33_s25 = int_to_ptr.vmem [resolvable:$true] %s32_s25  ;;  %s23_s27 = int_to_ptr.vmem [resolvable:$true] %s22_s27 }
   0x5   :  { %s761_s30 = scalar_lea.hbm %s999_s1, 128 }
   0x6   :  { %p762_p0 = scmp.ne.s32.totalorder %s999_s1, %s761_s30  ;;  %p765_p1 = scmp.lt.u32.totalorder %s761_s30, %s999_s1 }
   0x8   :  { %p767_p2 = pnand %p765_p1, %p762_p0 }
   0xa   :  { %770 = shalt.err (!%p767_p2)
}
   0xb   :  { %s771_s12 = scalar_lea.vmem %s33_s25, 128  ;;  %p776_p4 = scmp.lt.s32.totalorder %s33_s25, %s33_s25 }
   0xc   :  { %p772_p3 = scmp.ne.s32.totalorder %s33_s25, %s771_s12  ;;  %p777_p5 = scmp.lt.s32.totalorder %s771_s12, %s771_s12 }
   0xe   :  { %p778_p6 = por %p777_p5, %p776_p4 }
  0x10   :  { %p779_p7 = pnand %p778_p6, %p772_p3 }
  0x12   :  { %782 = shalt.err (!%p779_p7)
}
  0x13   :  { %35 = dma.hbm_to_vmem [thread:$0]  %s999_s1, 128, %s33_s25, [#allocation6]  }
  0x14   :  { %s783_s17 = scalar_lea.hbm %s998_s0, 128 }
  0x15   :  { %p784_p8 = scmp.ne.s32.totalorder %s998_s0, %s783_s17  ;;  %p787_p9 = scmp.lt.u32.totalorder %s783_s17, %s998_s0 }
  0x17   :  { %p789_p10 = pnand %p787_p9, %p784_p8 }
  0x19   :  { %792 = shalt.err (!%p789_p10)
}
  0x1a   :  { %s793_s22 = scalar_lea.vmem %s23_s27, 128  ;;  %p798_p12 = scmp.lt.s32.totalorder %s23_s27, %s23_s27 }
  0x1b   :  { %p794_p11 = scmp.ne.s32.totalorder %s23_s27, %s793_s22  ;;  %p799_p13 = scmp.lt.s32.totalorder %s793_s22, %s793_s22 }
  0x1d   :  { %p800_p0 = por %p799_p13, %p798_p12 }
  0x1f   :  { %p801_p1 = pnand %p800_p0, %p794_p11 }
  0x21   :  { %804 = shalt.err (!%p801_p1)
}
  0x22   :  { %25 = dma.hbm_to_vmem [thread:$0]  %s998_s0, 128, %s23_s27, [#allocation3]  }
  0x23   :  { %s881_s24 = smov [#allocation7]   ;;  %s805_s29 = scalar_lea.hbm %s1001_s3, 4096 }
  0x24   :  { %s43_s25 = sshll.u32 %s881_s24, 4  ;;  %p806_p2 = scmp.ne.s32.totalorder %s1001_s3, %s805_s29  ;;  %s44_s25 = int_to_ptr.vmem [resolvable:$true] %s43_s25 }
  0x25   :  { %p809_p3 = scmp.lt.u32.totalorder %s805_s29, %s1001_s3 }
  0x27   :  { %p811_p4 = pnand %p809_p3, %p806_p2 }
  0x29   :  { %814 = shalt.err (!%p811_p4)
}
  0x2a   :  { %s815_s11 = scalar_lea.vmem %s44_s25, 4096  ;;  %p820_p6 = scmp.lt.s32.totalorder %s44_s25, %s44_s25 }
  0x2b   :  { %p816_p5 = scmp.ne.s32.totalorder %s44_s25, %s815_s11  ;;  %p821_p7 = scmp.lt.s32.totalorder %s815_s11, %s815_s11 }
  0x2d   :  { %p822_p8 = por %p821_p7, %p820_p6 }
  0x2f   :  { %p823_p9 = pnand %p822_p8, %p816_p5 }
  0x31   :  { %826 = shalt.err (!%p823_p9)
}
  0x32   :  { %s882_s0 = smov 128   ;;  %s883_s27 = smov 8  }
  0x33   :  { %49 = dma.hbm_to_vmem [thread:$0]  %s1001_s3, 4096, %s44_s25, [#allocation6], %s882_s0, %s882_s0, %s883_s27  }
  0x34   :  { %s884_s14 = smov [#allocation8]   ;;  %s827_s18 = scalar_lea.hbm %s1003_s5, 2048 }
  0x35   :  { %s57_s15 = sshll.u32 %s884_s14, 4  ;;  %p828_p10 = scmp.ne.s32.totalorder %s1003_s5, %s827_s18  ;;  %s58_s15 = int_to_ptr.vmem [resolvable:$true] %s57_s15 }
  0x36   :  { %p831_p11 = scmp.lt.u32.totalorder %s827_s18, %s1003_s5 }
  0x38   :  { %p833_p12 = pnand %p831_p11, %p828_p10 }
  0x3a   :  { %836 = shalt.err (!%p833_p12)
}
  0x3b   :  { %s837_s1 = scalar_lea.vmem %s58_s15, 2048  ;;  %p842_p0 = scmp.lt.s32.totalorder %s58_s15, %s58_s15 }
  0x3c   :  { %p838_p13 = scmp.ne.s32.totalorder %s58_s15, %s837_s1  ;;  %p843_p1 = scmp.lt.s32.totalorder %s837_s1, %s837_s1 }
  0x3e   :  { %p844_p2 = por %p843_p1, %p842_p0 }
  0x40   :  { %p845_p3 = pnand %p844_p2, %p838_p13 }
  0x42   :  { %848 = shalt.err (!%p845_p3)
}
  0x43   :  { %s885_s3 = smov 64   ;;  %s886_s23 = smov 4  }
  0x44   :  { %63 = dma.hbm_to_vmem [thread:$0]  %s1003_s5, 2048, %s58_s15, [#allocation9], %s885_s3, %s885_s3, %s886_s23  }
  0x45   :  { %871 = dma.done.wait [#allocation3], 128  }
  0x46   :  { %872 = vsyncadd [#allocation3], 4294967168 }
  0x47   :  { %873 = dma.done.wait [#allocation6], 4224  }
  0x48   :  { %874 = vsyncadd [#allocation6], 4294963072 }
  0x49   :  { %875 = dma.done.wait [#allocation9], 2048  }
  0x4a   :  { %876 = vsyncadd [#allocation9], 4294965248  ;;  %v887_v0 = vmov 0   ;;  %v81_v1 = vld [vmem:[#allocation5] sm:$0xff]  ;;  %vm103_vm0 = vcmask 1043456   ;;  %v79_v2 = vld [vmem:[#allocation2] sm:$0xff]  ;;  %v84_v51 = vlaneseq }
  0x4b   :  { %142 = vmatprep.mubr.bf16.mxu0 %v887_v0  ;;  %v607_v3 = vcombine.high %v81_v1, %v81_v1  ;;  %v606_v4 = vcombine.low %v81_v1, %v81_v1  ;;  %v693_v5 = vld [vmem:[#allocation7 + $0x4] ss:$8 sps:$4 sm:$0xff]   ;;  %v695_v6 = vld [vmem:[#allocation7] ss:$8 sps:$4 sm:$0xff]   ;;  %v696_v7 = vld [vmem:[#allocation7 + $0x14] ss:$8 sps:$4 sm:$0xff]   ;;  %v80_v9 = vpack.c.bf16 %v79_v2, %v79_v2 }
  0x4c   :  { %359 = vmatprep.subr.bf16.mxu1 %v693_v5  ;;  %vm99_vm1 = vcmask 64512   ;;  %v698_v10 = vld [vmem:[#allocation7 + $0x10] ss:$8 sps:$4 sm:$0xff]   ;;  %v699_v11 = vld [vmem:[#allocation7 + $0x24] ss:$8 sps:$4 sm:$0xff]   ;;  %v85_v52 = vshrl.u32 %v84_v51, 7 }
  0x4d   :  { %608 = vmatprep.subr.msk.bf16.mxu0 %vm103_vm0, %v607_v3  ;;  %v105_v8 = vsel %vm103_vm0, %v606_v4, 0  ;;  %360 = vmatpush1.bf16.msra.mxu1 %v695_v6  ;;  %v701_v12 = vld [vmem:[#allocation7 + $0x20] ss:$8 sps:$4 sm:$0xff]   ;;  %v702_v13 = vld [vmem:[#allocation7 + $0x34] ss:$8 sps:$4 sm:$0xff]  }
  0x4e   :  { %111 = vmatpush1.bf16.msra.mxu0 %v105_v8  ;;  %361 = vmatprep.subr.bf16.mxu1 %v696_v7  ;;  %v704_v14 = vld [vmem:[#allocation7 + $0x30] ss:$8 sps:$4 sm:$0xff]   ;;  %v705_v15 = vld [vmem:[#allocation7 + $0x44] ss:$8 sps:$4 sm:$0xff]   ;;  %v707_v16 = vld [vmem:[#allocation7 + $0x40] ss:$8 sps:$4 sm:$0xff]  }
  0x4f   :  { %v708_v17 = vld [vmem:[#allocation7 + $0x54] ss:$8 sps:$4 sm:$0xff]   ;;  %v710_v18 = vld [vmem:[#allocation7 + $0x50] ss:$8 sps:$4 sm:$0xff]   ;;  %v711_v19 = vld [vmem:[#allocation7 + $0x64] ss:$8 sps:$4 sm:$0xff]  }
  0x50   :  { %v713_v20 = vld [vmem:[#allocation7 + $0x60] ss:$8 sps:$4 sm:$0xff]   ;;  %v714_v21 = vld [vmem:[#allocation7 + $0x74] ss:$8 sps:$4 sm:$0xff]   ;;  %v716_v22 = vld [vmem:[#allocation7 + $0x70] ss:$8 sps:$4 sm:$0xff]  }
  0x51   :  { %609 = vmatmul.mubr.msk.bf16.vlgmr.msra.gmra.mrb[0].mxu0 %vm99_vm1, %v80_v9  ;;  %362 = vmatpush1.bf16.msra.mxu1 %v698_v10  ;;  %v717_v23 = vld [vmem:[#allocation7 + $0x84] ss:$8 sps:$4 sm:$0xff]   ;;  %v719_v24 = vld [vmem:[#allocation7 + $0x80] ss:$8 sps:$4 sm:$0xff]   ;;  %v720_v25 = vld [vmem:[#allocation7 + $0x94] ss:$8 sps:$4 sm:$0xff]  }
  0x52   :  { %363 = vmatprep.subr.bf16.mxu1 %v699_v11  ;;  %v722_v26 = vld [vmem:[#allocation7 + $0x90] ss:$8 sps:$4 sm:$0xff]   ;;  %v723_v27 = vld [vmem:[#allocation7 + $0xa4] ss:$8 sps:$4 sm:$0xff]   ;;  %v725_v28 = vld [vmem:[#allocation7 + $0xa0] ss:$8 sps:$4 sm:$0xff]  }
  0x53   :  { %v726_v29 = vld [vmem:[#allocation7 + $0xb4] ss:$8 sps:$4 sm:$0xff]   ;;  %v728_v30 = vld [vmem:[#allocation7 + $0xb0] ss:$8 sps:$4 sm:$0xff]   ;;  %v729_v31 = vld [vmem:[#allocation7 + $0xc4] ss:$8 sps:$4 sm:$0xff]  }
  0x54   :  { %v731_v32 = vld [vmem:[#allocation7 + $0xc0] ss:$8 sps:$4 sm:$0xff]   ;;  %v732_v33 = vld [vmem:[#allocation7 + $0xd4] ss:$8 sps:$4 sm:$0xff]   ;;  %v734_v34 = vld [vmem:[#allocation7 + $0xd0] ss:$8 sps:$4 sm:$0xff]  }
  0x55   :  { %364 = vmatpush1.bf16.msra.mxu1 %v701_v12  ;;  %v735_v35 = vld [vmem:[#allocation7 + $0xe4] ss:$8 sps:$4 sm:$0xff]   ;;  %v737_v36 = vld [vmem:[#allocation7 + $0xe0] ss:$8 sps:$4 sm:$0xff]   ;;  %v738_v37 = vld [vmem:[#allocation7 + $0xf4] ss:$8 sps:$4 sm:$0xff]  }
  0x56   :  { %365 = vmatprep.subr.bf16.mxu1 %v702_v13  ;;  %v740_v38 = vld [vmem:[#allocation7 + $0xf0] ss:$8 sps:$4 sm:$0xff]   ;;  %v741_v39 = vld [vmem:[#allocation8 + $0x40] sm:$0xff]   ;;  %v743_v41 = vld [vmem:[#allocation8 + $0x48] sm:$0xff]   ;;  %v86_v53 = vsub.s32 0, %v85_v52  ;;  %v90_v55 = vsub.s32 1, %v85_v52 }
  0x57   :  { %v742_v40 = vld [vmem:[#allocation8] sm:$0xff]   ;;  %659 = vmatprep.subr.bf16.mxu0 %v741_v39  ;;  %v744_v42 = vld [vmem:[#allocation8 + $0x8] sm:$0xff]   ;;  %v745_v43 = vld [vmem:[#allocation8 + $0x50] sm:$0xff]  }
  0x58   :  { %660 = vmatpush3.bf16.msra.mxu0 %v742_v40  ;;  %v746_v44 = vld [vmem:[#allocation8 + $0x10] sm:$0xff]   ;;  %v747_v45 = vld [vmem:[#allocation8 + $0x58] sm:$0xff]   ;;  %v749_v47 = vld [vmem:[#allocation8 + $0x60] sm:$0xff]  }
  0x59   :  { %366 = vmatpush1.bf16.msra.mxu1 %v704_v14  ;;  %661 = vmatprep.subr.bf16.mxu0 %v743_v41  ;;  %v748_v46 = vld [vmem:[#allocation8 + $0x18] sm:$0xff]   ;;  %v750_v48 = vld [vmem:[#allocation8 + $0x20] sm:$0xff]   ;;  %v751_v49 = vld [vmem:[#allocation8 + $0x68] sm:$0xff]  }
  0x5a   :  { %367 = vmatprep.subr.bf16.mxu1 %v705_v15  ;;  %v752_v50 = vld [vmem:[#allocation8 + $0x28] sm:$0xff]   ;;  %v82_v54 = vld [vmem:[%s1000_s2] sm:$0x3]  ;;  %v755_v6 = vld [vmem:[#allocation8 + $0x78] sm:$0xff]  }
  0x5b   :  { %v87_v56 = vrot.slane %v82_v54, %v86_v53  ;;  %v91_v57 = vrot.slane %v82_v54, %v90_v55  ;;  %v753_v4 = vld [vmem:[#allocation8 + $0x70] sm:$0xff]   ;;  %v756_v7 = vld [vmem:[#allocation8 + $0x38] sm:$0xff]  }
  0x5c   :  { %662 = vmatpush3.bf16.msra.mxu0 %v744_v42  ;;  %v754_v5 = vld [vmem:[#allocation8 + $0x30] sm:$0xff]  }
  0x5d   :  { %368 = vmatpush1.bf16.msra.mxu1 %v707_v16  ;;  %663 = vmatprep.subr.bf16.mxu0 %v745_v43  ;;  %v187_v8 = vld [vmem:[%s1002_s4] sm:$0x3]  ;;  %s888_s4 = smov [#allocation10]  }
  0x5e   :  { %369 = vmatprep.subr.bf16.mxu1 %v708_v17  ;;  %v192_v9 = vrot.slane %v187_v8, %v86_v53  ;;  %v196_v10 = vrot.slane %v187_v8, %v90_v55  ;;  %s595_s8 = sshll.u32 %s888_s4, 4  ;;  %s596_s8 = int_to_ptr.vmem [resolvable:$true] %s595_s8 }
  0x5f   :  { %p854_p5 = scmp.lt.s32.totalorder %s596_s8, %s596_s8 }
  0x60   :  { %664 = vmatpush3.bf16.msra.mxu0 %v746_v44 }
  0x61   :  { %370 = vmatpush1.bf16.msra.mxu1 %v710_v18  ;;  %665 = vmatprep.subr.bf16.mxu0 %v747_v45 }
  0x62   :  { %371 = vmatprep.subr.bf16.mxu1 %v711_v19 }
  0x64   :  { %666 = vmatpush3.bf16.msra.mxu0 %v748_v46 }
  0x65   :  { %372 = vmatpush1.bf16.msra.mxu1 %v713_v20  ;;  %667 = vmatprep.subr.bf16.mxu0 %v749_v47 }
  0x66   :  { %373 = vmatprep.subr.bf16.mxu1 %v714_v21 }
  0x68   :  { %668 = vmatpush3.bf16.msra.mxu0 %v750_v48 }
  0x69   :  { %374 = vmatpush1.bf16.msra.mxu1 %v716_v22  ;;  %669 = vmatprep.subr.bf16.mxu0 %v751_v49 }
  0x6a   :  { %375 = vmatprep.subr.bf16.mxu1 %v717_v23  ;;  %v642_v23 = vld [vmem:[%s1004_s6] ss:$0 sm:$0xff]  ;;  %s849_s6 = scalar_lea.vmem %s596_s8, 128 }
  0x6b   :  { %p850_p4 = scmp.ne.s32.totalorder %s596_s8, %s849_s6  ;;  %p855_p6 = scmp.lt.s32.totalorder %s849_s6, %s849_s6 }
  0x6c   :  { %670 = vmatpush3.bf16.msra.mxu0 %v752_v50 }
  0x6d   :  { %376 = vmatpush1.bf16.msra.mxu1 %v719_v24  ;;  %671 = vmatprep.subr.bf16.mxu0 %v753_v4  ;;  %p856_p7 = por %p855_p6, %p854_p5 }
  0x6e   :  { %377 = vmatprep.subr.bf16.mxu1 %v720_v25 }
  0x6f   :  { %p857_p8 = pnand %p856_p7, %p850_p4 }
  0x70   :  { %672 = vmatpush3.bf16.msra.mxu0 %v754_v5 }
  0x71   :  { %378 = vmatpush1.bf16.msra.mxu1 %v722_v26  ;;  %673 = vmatprep.subr.bf16.mxu0 %v755_v6 }
  0x72   :  { %379 = vmatprep.subr.bf16.mxu1 %v723_v27 }
  0x74   :  { %674 = vmatpush3.bf16.msra.mxu0 %v756_v7 }
  0x75   :  { %380 = vmatpush1.bf16.msra.mxu1 %v725_v28 }
  0x76   :  { %381 = vmatprep.subr.bf16.mxu1 %v726_v29 }
  0x79   :  { %382 = vmatpush1.bf16.msra.mxu1 %v728_v30 }
  0x7a   :  { %383 = vmatprep.subr.bf16.mxu1 %v729_v31 }
  0x7d   :  { %384 = vmatpush1.bf16.msra.mxu1 %v731_v32 }
  0x7e   :  { %385 = vmatprep.subr.bf16.mxu1 %v732_v33 }
  0x81   :  { %386 = vmatpush1.bf16.msra.mxu1 %v734_v34 }
  0x82   :  { %387 = vmatprep.subr.bf16.mxu1 %v735_v35 }
  0x85   :  { %388 = vmatpush1.bf16.msra.mxu1 %v737_v36 }
  0x86   :  { %389 = vmatprep.subr.bf16.mxu1 %v738_v37 }
  0x89   :  { %390 = vmatpush1.bf16.msra.mxu1 %v740_v38 }
 0x124   :  { %v144_v58 = vpop.f32.mrb[0].mxu0 }
 0x125   :  { %v145_v59 = vadd.f32 %v144_v58, %v87_v56  ;;  %v146_v60 = vpop.f32.mrb[1].mxu0 }
 0x126   :  { %v147_v61 = vadd.f32 %v146_v60, %v91_v57  ;;  %v148_v62 = vpop.f32.mrb[2].mxu0 }
 0x127   :  { %v151_v63 = vmax.f32 %v145_v59, 0.0  ;;  %v149_v0 = vpop.f32.mrb[3].mxu0 }
 0x128   :  { %v152_v1 = vmax.f32 %v147_v61, 0.0 }
 0x129   :  { %v153_v3 = vpack.c.bf16 %v151_v63, %v151_v63 }
 0x12a   :  { %v154_v2 = vpack.c.bf16 %v152_v1, %v152_v1 }
 0x12c   :  { %391 = vmatprep.mubr.bf16.mxu1 %v154_v2 }
 0x12d   :  { %392 = vmatmul.mubr.bf16.vlgmr.msra.gmra.mrb[0].mxu1 %v153_v3 }
 0x200   :  { %v393_v11 = vpop.f32.mrb[0].mxu1 }
 0x201   :  { %v394_v12 = vadd.f32 %v393_v11, %v192_v9  ;;  %v395_v13 = vpop.f32.mrb[1].mxu1 }
 0x202   :  { %v396_v14 = vadd.f32 %v395_v13, %v196_v10  ;;  %v397_v15 = vpop.f32.mrb[2].mxu1 }
 0x203   :  { %v400_v16 = vmax.f32 %v394_v12, 0.0  ;;  %v398_v17 = vpop.f32.mrb[3].mxu1 }
 0x204   :  { %v401_v18 = vmax.f32 %v396_v14, 0.0 }
 0x205   :  { %v402_v20 = vpack.c.bf16 %v400_v16, %v400_v16 }
 0x206   :  { %v403_v19 = vpack.c.bf16 %v401_v18, %v401_v18 }
 0x208   :  { %571 = vmatprep.mubr.bf16.mxu0 %v403_v19 }
 0x209   :  { %572 = vmatmul.mubr.bf16.vlgmr.msra.gmra.mrb[4].mxu0 %v402_v20 }
 0x2dc   :  { %v675_v21 = vpop.f32.mrb[4].mxu0 }
 0x2dd   :  { %v676_v22 = vpop.f32.mrb[5].mxu0 }
 0x2de   :  { %v677_v24 = vadd.f32 %v676_v22, %v675_v21  ;;  %v678_v25 = vpop.f32.mrb[6].mxu0 }
 0x2df   :  { %v679_v26 = vpop.f32.mrb[7].mxu0 }
 0x2e0   :  { %v574_v27 = vadd.f32 %v677_v24, %v642_v23 }
 0x2e2   :  { %579 = vmax.xlane.f32.xlu0 %v574_v27 }
 0x36f   :  { %v580_v28 = vpop.xlane.xlu0 %579 }
 0x370   :  { %v581_v29 = vsub.f32 %v574_v27, %v580_v28 }
 0x372   :  { %v582_v30 = vmul.f32 1.442695, %v581_v29 }
 0x374   :  { %757 = vpow2.f32 %v582_v30 }
 0x37e   :  { %v758_v31 = vpop.eup %757 }
 0x37f   :  { %584 = vadd.xlane.f32.xlu0 %v758_v31 }
 0x40c   :  { %v585_v32 = vpop.xlane.xlu0 %584 }
 0x40d   :  { %759 = vrcp.f32 %v585_v32 }
 0x417   :  { %v760_v33 = vpop.eup %759 }
 0x418   :  { %v587_v34 = vmul.f32 %v760_v33, %v758_v31 }
 0x41a   :  { %588 = vst [vmem:[#allocation10] sm:$0xff] %v587_v34 }
 0x41b   :  { %860 = shalt.err (!%p857_p8)
}
 0x41c   :  { %s861_s11 = scalar_lea.hbm %s1005_s7, 128 }
 0x41d   :  { %p862_p9 = scmp.ne.s32.totalorder %s1005_s7, %s861_s11  ;;  %p865_p10 = scmp.lt.u32.totalorder %s861_s11, %s1005_s7 }
 0x41f   :  { %p867_p11 = pnand %p865_p10, %p862_p9 }
 0x421   :  { %870 = shalt.err (!%p867_p11)
}
 0x422   :  { %598 = dma.vmem_to_hbm [thread:$0]  %s596_s8, 128, %s1005_s7, [#allocation4]  }
 0x423   :  { %877 = dma.done.wait [#allocation4], 128  }
 0x424   :  { %878 = vsyncadd [#allocation4], 4294967168 }
 0x425   :  { %602 = vsyncpa [#allocation3], 1 }
 0x426   :  { %603 = vsyncpa [#allocation6], 1 }
 0x427   :  { %604 = vsyncpa [#allocation9], 1 }
 0x428   :  { %605 = vsyncpa [#allocation4], 1 }

</bundles_post_ra>
